<compile_context>
chip_gen: v6e
topology: v6e:2x2x1
jax: 0.10.0
libtpu: 0.0.40
codegen_flags: <defaults>
</compile_context>

<pallas_src>
import functools

import jax
import jax.numpy as jnp
from jax import lax
from jax.experimental import pallas as pl
from jax.experimental.pallas import tpu as pltpu


def _round_up(x, m):
    return ((x + m - 1) // m) * m


_CHUNK = 8  # one vreg sublane depth: the pairwise loop consumes 8 "other" rows per step


def _mbd_kernel(x_ref, w_ref, b_ref, seg_ref, o_ref, acc_ref, *, n_valid):
    """One K step of m = x @ W^T; at the last step bias + the pairwise feature stage.

    x_ref  : (N_pad, tk)      bf16  K-tile of the flattened (row-padded) input
    w_ref  : (tk, n_B*n_C)    bf16  K-tile of W^T
    b_ref  : (1, n_B*n_C)     f32   bias (resident)
    seg_ref: (n_B*n_C, n_B)   bf16  0/1 block-indicator for the n_C segment sum
    o_ref  : (N_pad, n_B)     f32   minibatch-discrimination features
    acc_ref: (N_pad, n_B*n_C) f32   VMEM accumulator for m
    """
    k = pl.program_id(0)

    @pl.when(k == 0)
    def _init():
        acc_ref[...] = jnp.zeros_like(acc_ref)

    # bf16 x bf16 -> f32 MXU matmul; operands were pre-cast in the wrapper.
    acc_ref[...] += jnp.dot(x_ref[...], w_ref[...], preferred_element_type=jnp.float32)

    @pl.when(k == pl.num_programs(0) - 1)
    def _finalize():
        n_pad, nbc = acc_ref.shape
        n_b = o_ref.shape[1]

        # Bias added exactly once.  Rows beyond the real batch (padding) are poisoned with a
        # huge value: every |m_real - 1e9| distance is ~1e9, so exp(-d) underflows to 0 and
        # pad rows contribute nothing to the real rows' o.  (Their own o rows are discarded.)
        m_b = acc_ref[...] + b_ref[...]
        if n_pad > n_valid:  # static Python decision
            row = lax.broadcasted_iota(jnp.int32, (n_pad, nbc), 0)
            m_b = jnp.where(row < n_valid, m_b, jnp.float32(1e9))
        acc_ref[...] = m_b

        num_chunks = n_pad // _CHUNK

        def body(ci, o_acc):
            i0 = pl.multiple_of(ci * _CHUNK, _CHUNK)
            # Re-read from VMEM each iteration (cheap vld) instead of pinning m in vregs.
            m_all = acc_ref[...]                              # (n_pad, nbc)
            m_chunk = acc_ref[pl.ds(i0, _CHUNK), :]           # (8, nbc) rows i0..i0+7
            diff = jnp.abs(m_all[None, :, :] - m_chunk[:, None, :])     # (8, n_pad, nbc)
            diff_bf = diff.reshape(_CHUNK * n_pad, nbc).astype(jnp.bfloat16)
            # Segment (n_C) L1 sums via one explicit-bf16 MXU matmul; f32 accumulation.
            d = jnp.dot(diff_bf, seg_ref[...], preferred_element_type=jnp.float32)
            e = jnp.exp(-d).reshape(_CHUNK, n_pad, n_b)
            return o_acc + e.sum(axis=0)

        o = lax.fori_loop(0, num_chunks, body,
                          jnp.zeros((n_pad, n_b), jnp.float32),
                          unroll=(num_chunks <= 2))
        o_ref[...] = o


def _pick_tk(n_in128, n_pad, nbc, tk_target):
    """Largest K tile that fits the input budget; skip K tiling entirely when possible."""
    if tk_target is not None:
        return min(_round_up(tk_target, 128), n_in128)

    def tiled_bytes(tk):  # bf16 x + bf16 W, double-buffered
        return 2 * n_pad * tk * 2 + 2 * tk * nbc * 2

    budget = 16 * 2**20  # leaves room for acc scratch + pairwise slabs inside the 32 MiB cap
    if tiled_bytes(n_in128) <= budget:
        return n_in128               # no K tiling: single resident tile
    for tk in (2048, 1024, 512, 256, 128):
        if tk < n_in128 and tiled_bytes(tk) <= budget:
            return tk
    return 128


def _block_spec(block_shape, index_map, buffers=None):
    """BlockSpec with optional deeper pipelining; falls back cleanly if unsupported."""
    if buffers is not None and hasattr(pl, "Buffered"):
        try:
            return pl.BlockSpec(block_shape, index_map, pipeline_mode=pl.Buffered(buffers))
        except TypeError:
            pass
    return pl.BlockSpec(block_shape, index_map)


def minibatch_discrimination(x, weight, bias, n_B, n_C, *, tk_target=None):
    """x: (N, C, H, W). weight: (n_B*n_C, n_in). bias: (n_B*n_C,). Returns (N, n_in + n_B)."""
    N = x.shape[0]
    x_flat = x.reshape(N, -1)                 # row-major flatten == torch reshape
    n_in = x_flat.shape[1]
    nBC = n_B * n_C

    n_pad = _round_up(max(N, _CHUNK), _CHUNK)           # 8-row (sublane) aligned batch
    n_in128 = _round_up(n_in, 128)
    tk = _pick_tk(n_in128, n_pad, nBC, tk_target)
    n_in_pad = _round_up(n_in, tk)                      # zero K-padding contributes 0 to m
    num_k = n_in_pad // tk

    # bf16 operands built in the wrapper: halves x/W HBM->VMEM traffic; accumulation stays f32.
    x_in = jnp.pad(x_flat.astype(jnp.bfloat16),
                   ((0, n_pad - N), (0, n_in_pad - n_in)))
    w_t = jnp.pad(weight, ((0, 0), (0, n_in_pad - n_in))).T.astype(jnp.bfloat16)
    b2d = bias.reshape(1, nBC).astype(jnp.float32)
    # 0/1 block indicator (exact in bf16): seg[c, b] = 1 iff flat feature c belongs to kernel b.
    seg = (jnp.arange(nBC, dtype=jnp.int32)[:, None] // n_C
           == jnp.arange(n_B, dtype=jnp.int32)[None, :]).astype(jnp.bfloat16)

    # Deeper W^T pipeline only when K tiling remains (helps v5e's lower HBM bandwidth).
    w_buffers = 3 if num_k >= 3 else None

    # Tight VMEM budget: ~2x estimate, capped at 32 MiB (comfortable on v7x's 64 MiB VMEM).
    est = (2 * n_pad * tk * 2                         # x tiles (bf16, double-buffered)
           + (w_buffers or 2) * tk * nBC * 2          # W^T tiles (bf16)
           + 2 * nBC * 4 + 2 * nBC * n_B * 2          # bias + seg
           + n_pad * nBC * 4                          # accumulator scratch
           + 2 * n_pad * n_B * 4                      # o output block
           + _CHUNK * n_pad * nBC * 6                 # pairwise |diff| slab (f32 + bf16)
           + _CHUNK * n_pad * n_B * 8)                # d + exp(-d)
    vmem_limit = int(min(32 * 2**20, max(2 * est, 16 * 2**20)))
    vmem_limit = max(vmem_limit, int(1.5 * est))      # never starve very large shapes

    kernel = functools.partial(_mbd_kernel, n_valid=N)
    o = pl.pallas_call(
        kernel,
        out_shape=jax.ShapeDtypeStruct((n_pad, n_B), jnp.float32),
        grid_spec=pltpu.PrefetchScalarGridSpec(
            num_scalar_prefetch=0,
            grid=(num_k,),
            in_specs=[
                pl.BlockSpec((n_pad, tk), lambda k: (0, k)),           # x K-tile
                _block_spec((tk, nBC), lambda k: (k, 0), w_buffers),   # W^T K-tile
                pl.BlockSpec((1, nBC), lambda k: (0, 0)),              # bias (resident)
                pl.BlockSpec((nBC, n_B), lambda k: (0, 0)),            # segment indicator
            ],
            out_specs=pl.BlockSpec((n_pad, n_B), lambda k: (0, 0)),
            scratch_shapes=[pltpu.VMEM((n_pad, nBC), jnp.float32)],
        ),
        compiler_params=pltpu.CompilerParams(
            dimension_semantics=("arbitrary",),   # the single grid axis is the K reduction
            vmem_limit_bytes=vmem_limit,
        ),
    )(x_in, w_t, b2d, seg)

    # torch.cat((x, o), dim=1): f32 pass-through stays exact and outside the kernel.
    return jnp.concatenate([x_flat, o[:N].astype(x_flat.dtype)], axis=1)


def reference(x, weight, bias, n_B, n_C):
    N = x.shape[0]
    xf = x.reshape(N, -1)
    m = (xf @ weight.T + bias).reshape(N, n_B, n_C)
    o = jnp.exp(-jnp.abs(m[None] - m[:, None]).sum(-1)).sum(0)
    return jnp.concatenate((xf, o), axis=1)


def _run_case(key, N, C, H, W, n_B, n_C, tk_target=None):
    n_in = C * H * W
    kx, kw, kb = jax.random.split(key, 3)
    x = jax.random.normal(kx, (N, C, H, W), dtype=jnp.float32)
    # xavier_uniform_ weight, default-Linear uniform bias (deterministic init).
    xavier_bound = (6.0 / (n_in + n_B * n_C)) ** 0.5
    weight = jax.random.uniform(kw, (n_B * n_C, n_in), jnp.float32,
                                -xavier_bound, xavier_bound)
    bias_bound = 1.0 / (n_in ** 0.5)
    bias = jax.random.uniform(kb, (n_B * n_C,), jnp.float32,
                              -bias_bound, bias_bound)

    out = jax.block_until_ready(
        minibatch_discrimination(x, weight, bias, n_B, n_C, tk_target=tk_target))
    ref = jax.block_until_ready(reference(x, weight, bias, n_B, n_C))

    assert out.shape == (N, n_in + n_B)
    # x pass-through columns must be exact.
    assert jnp.array_equal(out[:, :n_in], x.reshape(N, -1)), "passthrough mismatch"
    # o columns: bf16 MXU operands (f32 accumulation) -> slightly looser tolerance.
    assert jnp.allclose(out, ref, atol=2e-3, rtol=2e-3), "mismatch vs reference"


if __name__ == "__main__":
    key = jax.random.PRNGKey(0)
    k1, k2, k3 = jax.random.split(key, 3)

    # Main case (module's intended use): single resident K tile, batch-row padding path.
    _run_case(k1, N=2, C=4, H=16, W=16, n_B=32, n_C=8)
    # Non-128-aligned n_in: exercises zero K-padding + poisoned pad rows.
    _run_case(k2, N=3, C=3, H=10, W=10, n_B=4, n_C=32)
    # Forced small K tile: exercises the multi-step K-pipelined accumulation path.
    _run_case(k3, N=2, C=4, H=16, W=16, n_B=32, n_C=8, tk_target=512)

    print("KERNEL_OK")
</pallas_src>

<mosaic_0001>
module attributes {stable_mosaic.version = 11 : i64} {
  func.func @_mbd_kernel(%arg0: i32, %arg1: memref<8x1024xbf16, #tpu.memory_space<vmem>>, %arg2: memref<1024x256xbf16, #tpu.memory_space<vmem>>, %arg3: memref<1x256xf32, #tpu.memory_space<vmem>>, %arg4: memref<256x32xbf16, #tpu.memory_space<vmem>>, %arg5: memref<8x32xf32, #tpu.memory_space<vmem>>, %arg6: memref<8x256xf32, #tpu.memory_space<vmem>>) attributes {dimension_semantics = [#tpu.dimension_semantics<arbitrary>], iteration_bounds = array<i64: 1>, scalar_prefetch = 0 : i64, scratch_operands = 1 : i64, tpu.core_type = #tpu.core_type<tc>, window_params = [{transform_indices = @transform_0, window_bounds = array<i64: 8, 1024>}, {transform_indices = @transform_1, window_bounds = array<i64: 1024, 256>}, {pipeline_mode = #tpu.pipeline_mode<synchronous>, transform_indices = @transform_2, window_bounds = array<i64: 1, 256>}, {pipeline_mode = #tpu.pipeline_mode<synchronous>, transform_indices = @transform_3, window_bounds = array<i64: 256, 32>}, {pipeline_mode = #tpu.pipeline_mode<synchronous>, transform_indices = @transform_4, window_bounds = array<i64: 8, 32>}]} {
    %c0_i32 = arith.constant 0 : i32
    %0 = arith.cmpi eq, %arg0, %c0_i32 : i32
    %1 = arith.extui %0 : i1 to i32
    %c0_i32_0 = arith.constant 0 : i32
    %2 = arith.cmpi ne, %1, %c0_i32_0 : i32
    scf.if %2 {
      %cst_10 = arith.constant 0.000000e+00 : f32
      %12 = vector.broadcast %cst_10 : f32 to vector<8x256xf32>
      %c0_11 = arith.constant 0 : index
      %c0_12 = arith.constant 0 : index
      %13 = vector.load %arg6[%c0_11, %c0_12] : memref<8x256xf32, #tpu.memory_space<vmem>>, vector<8x256xf32>
      tpu.vector_store %arg6[%c0_11, %c0_12], %12 {strides = array<i32>} : memref<8x256xf32, #tpu.memory_space<vmem>>, vector<8x256xf32>,
    } else {
    }
    %c0 = arith.constant 0 : index
    %c0_1 = arith.constant 0 : index
    %3 = vector.load %arg6[%c0, %c0_1] : memref<8x256xf32, #tpu.memory_space<vmem>>, vector<8x256xf32>
    %c0_2 = arith.constant 0 : index
    %c0_3 = arith.constant 0 : index
    %4 = vector.load %arg1[%c0_2, %c0_3] : memref<8x1024xbf16, #tpu.memory_space<vmem>>, vector<8x1024xbf16>
    %c0_4 = arith.constant 0 : index
    %c0_5 = arith.constant 0 : index
    %5 = vector.load %arg2[%c0_4, %c0_5] : memref<1024x256xbf16, #tpu.memory_space<vmem>>, vector<1024x256xbf16>
    %cst = arith.constant dense<0.000000e+00> : vector<8x256xf32>
    %6 = tpu.matmul %4, %5, %cst {dimension_numbers = #tpu.dot_dimension_numbers<[1], [0], [0], [1], [0, 0, 1, 1], [], []>} : vector<8x1024xbf16>, vector<1024x256xbf16>, vector<8x256xf32> -> vector<8x256xf32>
    %7 = arith.addf %3, %6 : vector<8x256xf32>
    %c0_6 = arith.constant 0 : index
    %c0_7 = arith.constant 0 : index
    %8 = vector.load %arg6[%c0_6, %c0_7] : memref<8x256xf32, #tpu.memory_space<vmem>>, vector<8x256xf32>
    tpu.vector_store %arg6[%c0_6, %c0_7], %7 {strides = array<i32>} : memref<8x256xf32, #tpu.memory_space<vmem>>, vector<8x256xf32>,
    %c0_i32_8 = arith.constant 0 : i32
    %9 = arith.cmpi eq, %arg0, %c0_i32_8 : i32
    %10 = arith.extui %9 : i1 to i32
    %c0_i32_9 = arith.constant 0 : i32
    %11 = arith.cmpi ne, %10, %c0_i32_9 : i32
    scf.if %11 {
      %c0_10 = arith.constant 0 : index
      %c0_11 = arith.constant 0 : index
      %12 = vector.load %arg6[%c0_10, %c0_11] : memref<8x256xf32, #tpu.memory_space<vmem>>, vector<8x256xf32>
      %c0_12 = arith.constant 0 : index
      %c0_13 = arith.constant 0 : index
      %13 = vector.load %arg3[%c0_12, %c0_13] : memref<1x256xf32, #tpu.memory_space<vmem>>, vector<1x256xf32>
      %14 = vector.broadcast %13 : vector<1x256xf32> to vector<8x256xf32>
      %15 = arith.addf %12, %14 : vector<8x256xf32>
      %16 = tpu.iota {dimensions = array<i32: 0>} : vector<8x256xi32>
      %c2_i32 = arith.constant 2 : i32
      %17 = vector.broadcast %c2_i32 : i32 to vector<8x256xi32>
      %18 = arith.cmpi slt, %16, %17 : vector<8x256xi32>
      %cst_14 = arith.constant 1.000000e+09 : f32
      %19 = vector.broadcast %cst_14 : f32 to vector<8x256xf32>
      %20 = arith.select %18, %15, %19 : vector<8x256xi1>, vector<8x256xf32>
      %c0_15 = arith.constant 0 : index
      %c0_16 = arith.constant 0 : index
      %21 = vector.load %arg6[%c0_15, %c0_16] : memref<8x256xf32, #tpu.memory_space<vmem>>, vector<8x256xf32>
      tpu.vector_store %arg6[%c0_15, %c0_16], %20 {strides = array<i32>} : memref<8x256xf32, #tpu.memory_space<vmem>>, vector<8x256xf32>,
      %cst_17 = arith.constant 0.000000e+00 : f32
      %22 = vector.broadcast %cst_17 : f32 to vector<8x32xf32>
      %c0_i32_18 = arith.constant 0 : i32
      %c8_i32 = arith.constant 8 : i32
      %23 = arith.muli %c0_i32_18, %c8_i32 : i32
      %24 = tpu.assume_multiple %23, 8 : i32
      %c0_19 = arith.constant 0 : index
      %c0_20 = arith.constant 0 : index
      %25 = vector.load %arg6[%c0_19, %c0_20] : memref<8x256xf32, #tpu.memory_space<vmem>>, vector<8x256xf32>
      %26 = arith.index_cast %24 : i32 to index
      %c0_21 = arith.constant 0 : index
      %27 = vector.load %arg6[%26, %c0_21] : memref<8x256xf32, #tpu.memory_space<vmem>>, vector<8x256xf32>
      %28 = vector.shape_cast %25 : vector<8x256xf32> to vector<1x8x256xf32>
      %29 = vector.shape_cast %27 : vector<8x256xf32> to vector<8x1x256xf32>
      %30 = vector.broadcast %28 : vector<1x8x256xf32> to vector<8x8x256xf32>
      %31 = vector.broadcast %29 : vector<8x1x256xf32> to vector<8x8x256xf32>
      %32 = arith.subf %30, %31 : vector<8x8x256xf32>
      %33 = math.absf %32 : vector<8x8x256xf32>
      %34 = vector.shape_cast %33 : vector<8x8x256xf32> to vector<64x256xf32>
      %35 = arith.truncf %34 : vector<64x256xf32> to vector<64x256xbf16>
      %c0_22 = arith.constant 0 : index
      %c0_23 = arith.constant 0 : index
      %36 = vector.load %arg4[%c0_22, %c0_23] : memref<256x32xbf16, #tpu.memory_space<vmem>>, vector<256x32xbf16>
      %cst_24 = arith.constant dense<0.000000e+00> : vector<64x32xf32>
      %37 = tpu.matmul %35, %36, %cst_24 {dimension_numbers = #tpu.dot_dimension_numbers<[1], [0], [0], [1], [0, 0, 1, 1], [], []>} : vector<64x256xbf16>, vector<256x32xbf16>, vector<64x32xf32> -> vector<64x32xf32>
      %cst_25 = arith.constant 0.000000e+00 : f32
      %38 = vector.broadcast %cst_25 : f32 to vector<64x32xf32>
      %39 = arith.subf %38, %37 : vector<64x32xf32>
      %40 = math.exp %39 : vector<64x32xf32>
      %41 = vector.shape_cast %40 : vector<64x32xf32> to vector<8x8x32xf32>
      %cst_26 = arith.constant dense<0.000000e+00> : vector<8x32xf32>
      %42 = vector.multi_reduction <add>, %41, %cst_26 [0] : vector<8x8x32xf32> to vector<8x32xf32>
      %43 = arith.addf %22, %42 : vector<8x32xf32>
      %c1_i32 = arith.constant 1 : i32
      %c0_27 = arith.constant 0 : index
      %c0_28 = arith.constant 0 : index
      %44 = vector.load %arg5[%c0_27, %c0_28] : memref<8x32xf32, #tpu.memory_space<vmem>>, vector<8x32xf32>
      tpu.vector_store %arg5[%c0_27, %c0_28], %43 {strides = array<i32>} : memref<8x32xf32, #tpu.memory_space<vmem>>, vector<8x32xf32>,
    } else {
    }
    return
  }
  func.func @transform_0(%arg0: i32) -> (i32, i32) {
    %c0_i32 = arith.constant 0 : i32
    %c0_i32_0 = arith.constant 0 : i32
    return %c0_i32, %arg0 : i32, i32
  }
  func.func @transform_1(%arg0: i32) -> (i32, i32) {
    %c0_i32 = arith.constant 0 : i32
    %c0_i32_0 = arith.constant 0 : i32
    return %arg0, %c0_i32 : i32, i32
  }
  func.func @transform_2(%arg0: i32) -> (i32, i32) {
    %c0_i32 = arith.constant 0 : i32
    %c0_i32_0 = arith.constant 0 : i32
    %c0_i32_1 = arith.constant 0 : i32
    return %c0_i32, %c0_i32_0 : i32, i32
  }
  func.func @transform_3(%arg0: i32) -> (i32, i32) {
    %c0_i32 = arith.constant 0 : i32
    %c0_i32_0 = arith.constant 0 : i32
    %c0_i32_1 = arith.constant 0 : i32
    return %c0_i32, %c0_i32_0 : i32, i32
  }
  func.func @transform_4(%arg0: i32) -> (i32, i32) {
    %c0_i32 = arith.constant 0 : i32
    %c0_i32_0 = arith.constant 0 : i32
    %c0_i32_1 = arith.constant 0 : i32
    return %c0_i32, %c0_i32_0 : i32, i32
  }
}

</mosaic_0001>

<bundles_post_ra>
// kernel: tpu_custom_call.1
= control target key start
LH: loop header
LB: loop body
LE: loop exit
PB: predicated region body
PF: predicated region fallthrough
CT: control target
= control target key end

     0   :  { %9 = vsyncpa [#allocation4], 0  ;;  %s2107_s0 = inlined_call_operand.vmem [shape: bf16[8,1024], index: 0, kind: input, shape index: {}]   ;;  %s2108_s1 = inlined_call_operand.hbm [shape: bf16[1024,256], index: 1, kind: input, shape index: {}]   ;;  %s2109_s2 = inlined_call_operand.vmem [shape: f32[1,256], index: 2, kind: input, shape index: {}]   ;;  %s2110_s3 = inlined_call_operand.vmem [shape: bf16[256,32], index: 3, kind: input, shape index: {}]   ;;  %s2111_s4 = inlined_call_operand.hbm [shape: f32[8,32], index: 4, kind: output, shape index: {}]  }
   0x1   :  { %10 = vsyncpa [#allocation5], 0  ;;  %s1953_s15 = smov [#allocation3]  }
   0x2   :  { %s18_s16 = sshll.u32 %s1953_s15, 4  ;;  %s19_s16 = int_to_ptr.vmem [resolvable:$true] %s18_s16 }
   0x3   :  { %s1917_s17 = scalar_lea.vmem %s19_s16, 16384  ;;  %p1922_p1 = scmp.lt.s32.totalorder %s19_s16, %s19_s16 }
   0x4   :  { %p1918_p0 = scmp.ne.s32.totalorder %s19_s16, %s1917_s17  ;;  %p1923_p2 = scmp.lt.s32.totalorder %s1917_s17, %s1917_s17 }
   0x6   :  { %p1924_p3 = por %p1923_p2, %p1922_p1 }
   0x8   :  { %p1925_p4 = pnand %p1924_p3, %p1918_p0 }
   0xa   :  { %1928 = shalt.err (!%p1925_p4)
}
   0xb   :  { %s1954_s18 = smov 128   ;;  %s1955_s19 = smov 8  }
   0xc   :  { %24 = dma.hbm_to_vmem [thread:$0]  %s2108_s1, 16384, %s19_s16, [#allocation4], %s1954_s18, %s1954_s18, %s1955_s19  }
   0xd   :  { %1949 = dma.done.wait [#allocation4], 16384  }
   0xe   :  { %1950 = vsyncadd [#allocation4], 4294950912  ;;  %v1677_v0 = vld [vmem:[#allocation3 + $0x74] ss:$8 sps:$4 sm:$0xff]   ;;  %v1681_v2 = vld [vmem:[#allocation3 + $0x70] ss:$8 sps:$4 sm:$0xff]  }
   0xf   :  { %v1679_v1 = vld [vmem:[#allocation3 + $0x174] ss:$8 sps:$4 sm:$0xff]   ;;  %841 = vmatprep.subr.bf16.mxu0 %v1677_v0  ;;  %v1682_v3 = vld [vmem:[#allocation3 + $0x170] ss:$8 sps:$4 sm:$0xff]   ;;  %v1683_v4 = vld [vmem:[#allocation3 + $0x64] ss:$8 sps:$4 sm:$0xff]  }
  0x10   :  { %882 = vmatprep.subr.bf16.mxu1 %v1679_v1  ;;  %842 = vmatpush1.bf16.msra.mxu0 %v1681_v2  ;;  %v1685_v5 = vld [vmem:[#allocation3 + $0x164] ss:$8 sps:$4 sm:$0xff]   ;;  %v1687_v6 = vld [vmem:[#allocation3 + $0x60] ss:$8 sps:$4 sm:$0xff]   ;;  %v1689_v8 = vld [vmem:[#allocation3 + $0x54] ss:$8 sps:$4 sm:$0xff]  }
  0x11   :  { %883 = vmatpush1.bf16.msra.mxu1 %v1682_v3  ;;  %843 = vmatprep.subr.bf16.mxu0 %v1683_v4  ;;  %v1688_v7 = vld [vmem:[#allocation3 + $0x160] ss:$8 sps:$4 sm:$0xff]   ;;  %v1691_v9 = vld [vmem:[#allocation3 + $0x154] ss:$8 sps:$4 sm:$0xff]   ;;  %v1693_v10 = vld [vmem:[#allocation3 + $0x50] ss:$8 sps:$4 sm:$0xff]  }
  0x12   :  { %884 = vmatprep.subr.bf16.mxu1 %v1685_v5  ;;  %v1694_v11 = vld [vmem:[#allocation3 + $0x150] ss:$8 sps:$4 sm:$0xff]   ;;  %v1695_v12 = vld [vmem:[#allocation3 + $0x44] ss:$8 sps:$4 sm:$0xff]   ;;  %v1699_v14 = vld [vmem:[#allocation3 + $0x40] ss:$8 sps:$4 sm:$0xff]  }
  0x13   :  { %v1697_v13 = vld [vmem:[#allocation3 + $0x144] ss:$8 sps:$4 sm:$0xff]   ;;  %v1700_v15 = vld [vmem:[#allocation3 + $0x140] ss:$8 sps:$4 sm:$0xff]   ;;  %v1701_v16 = vld [vmem:[#allocation3 + $0x34] ss:$8 sps:$4 sm:$0xff]  }
  0x14   :  { %844 = vmatpush1.bf16.msra.mxu0 %v1687_v6  ;;  %v1703_v17 = vld [vmem:[#allocation3 + $0x134] ss:$8 sps:$4 sm:$0xff]   ;;  %v1705_v18 = vld [vmem:[#allocation3 + $0x30] ss:$8 sps:$4 sm:$0xff]   ;;  %v1707_v20 = vld [vmem:[#allocation3 + $0x24] ss:$8 sps:$4 sm:$0xff]  }
  0x15   :  { %885 = vmatpush1.bf16.msra.mxu1 %v1688_v7  ;;  %845 = vmatprep.subr.bf16.mxu0 %v1689_v8  ;;  %v1706_v19 = vld [vmem:[#allocation3 + $0x130] ss:$8 sps:$4 sm:$0xff]   ;;  %v1709_v21 = vld [vmem:[#allocation3 + $0x124] ss:$8 sps:$4 sm:$0xff]   ;;  %v1711_v22 = vld [vmem:[#allocation3 + $0x20] ss:$8 sps:$4 sm:$0xff]  }
  0x16   :  { %886 = vmatprep.subr.bf16.mxu1 %v1691_v9  ;;  %v1712_v23 = vld [vmem:[#allocation3 + $0x120] ss:$8 sps:$4 sm:$0xff]   ;;  %v1713_v24 = vld [vmem:[#allocation3 + $0x14] ss:$8 sps:$4 sm:$0xff]   ;;  %v1717_v26 = vld [vmem:[#allocation3 + $0x10] ss:$8 sps:$4 sm:$0xff]  }
  0x17   :  { %v1715_v25 = vld [vmem:[#allocation3 + $0x114] ss:$8 sps:$4 sm:$0xff]   ;;  %v1718_v27 = vld [vmem:[#allocation3 + $0x110] ss:$8 sps:$4 sm:$0xff]   ;;  %v1719_v28 = vld [vmem:[#allocation3 + $0x4] ss:$8 sps:$4 sm:$0xff]  }
  0x18   :  { %846 = vmatpush1.bf16.msra.mxu0 %v1693_v10  ;;  %v1721_v29 = vld [vmem:[#allocation3 + $0x104] ss:$8 sps:$4 sm:$0xff]   ;;  %v1723_v30 = vld [vmem:[#allocation3] ss:$8 sps:$4 sm:$0xff]   ;;  %v1725_v32 = vld [vmem:[#allocation3 + $0xf4] ss:$8 sps:$4 sm:$0xff]  }
  0x19   :  { %887 = vmatpush1.bf16.msra.mxu1 %v1694_v11  ;;  %847 = vmatprep.subr.bf16.mxu0 %v1695_v12  ;;  %v1724_v31 = vld [vmem:[#allocation3 + $0x100] ss:$8 sps:$4 sm:$0xff]   ;;  %v1727_v33 = vld [vmem:[#allocation3 + $0x1f4] ss:$8 sps:$4 sm:$0xff]   ;;  %v1729_v34 = vld [vmem:[#allocation3 + $0xf0] ss:$8 sps:$4 sm:$0xff]  }
  0x1a   :  { %888 = vmatprep.subr.bf16.mxu1 %v1697_v13  ;;  %v1730_v35 = vld [vmem:[#allocation3 + $0x1f0] ss:$8 sps:$4 sm:$0xff]   ;;  %v1731_v36 = vld [vmem:[#allocation3 + $0xe4] ss:$8 sps:$4 sm:$0xff]   ;;  %v1735_v38 = vld [vmem:[#allocation3 + $0xe0] ss:$8 sps:$4 sm:$0xff]  }
  0x1b   :  { %v1733_v37 = vld [vmem:[#allocation3 + $0x1e4] ss:$8 sps:$4 sm:$0xff]   ;;  %v1736_v39 = vld [vmem:[#allocation3 + $0x1e0] ss:$8 sps:$4 sm:$0xff]   ;;  %v1737_v40 = vld [vmem:[#allocation3 + $0xd4] ss:$8 sps:$4 sm:$0xff]  }
  0x1c   :  { %848 = vmatpush1.bf16.msra.mxu0 %v1699_v14  ;;  %v1739_v41 = vld [vmem:[#allocation3 + $0x1d4] ss:$8 sps:$4 sm:$0xff]   ;;  %v1741_v42 = vld [vmem:[#allocation3 + $0xd0] ss:$8 sps:$4 sm:$0xff]   ;;  %v1743_v44 = vld [vmem:[#allocation3 + $0xc4] ss:$8 sps:$4 sm:$0xff]  }
  0x1d   :  { %889 = vmatpush1.bf16.msra.mxu1 %v1700_v15  ;;  %849 = vmatprep.subr.bf16.mxu0 %v1701_v16  ;;  %v1742_v43 = vld [vmem:[#allocation3 + $0x1d0] ss:$8 sps:$4 sm:$0xff]   ;;  %v1745_v45 = vld [vmem:[#allocation3 + $0x1c4] ss:$8 sps:$4 sm:$0xff]   ;;  %v1747_v49 = vld [vmem:[#allocation3 + $0xc0] ss:$8 sps:$4 sm:$0xff]  }
  0x1e   :  { %890 = vmatprep.subr.bf16.mxu1 %v1703_v17  ;;  %v41_v46 = vld [vmem:[%s2107_s0] sm:$0xff]  ;;  %v42_v48 = vld [vmem:[%s2107_s0 + $0x8] sm:$0xff]  ;;  %v1749_v52 = vld [vmem:[#allocation3 + $0xb4] ss:$8 sps:$4 sm:$0xff]   ;;  %vm1431_vm1 = vcmask 261120  }
  0x1f   :  { %v1465_v47 = vcombine.high %v41_v46, %v41_v46  ;;  %v1748_v50 = vld [vmem:[#allocation3 + $0x1c0] ss:$8 sps:$4 sm:$0xff]   ;;  %v1467_v51 = vcombine.high %v42_v48, %v42_v48  ;;  %v1751_v53 = vld [vmem:[#allocation3 + $0x1b4] ss:$8 sps:$4 sm:$0xff]   ;;  %v1753_v54 = vld [vmem:[#allocation3 + $0xb0] ss:$8 sps:$4 sm:$0xff]   ;;  %v1464_v6 = vcombine.low %v41_v46, %v41_v46  ;;  %v1466_v7 = vcombine.low %v42_v48, %v42_v48 }
  0x20   :  { %850 = vmatpush1.bf16.msra.mxu0 %v1705_v18  ;;  %v1754_v55 = vld [vmem:[#allocation3 + $0x1b0] ss:$8 sps:$4 sm:$0xff]   ;;  %v1755_v56 = vld [vmem:[#allocation3 + $0xa4] ss:$8 sps:$4 sm:$0xff]   ;;  %v1759_v58 = vld [vmem:[#allocation3 + $0xa0] ss:$8 sps:$4 sm:$0xff]  }
  0x21   :  { %891 = vmatpush1.bf16.msra.mxu1 %v1706_v19  ;;  %851 = vmatprep.subr.bf16.mxu0 %v1707_v20  ;;  %v1757_v57 = vld [vmem:[#allocation3 + $0x1a4] ss:$8 sps:$4 sm:$0xff]   ;;  %v1760_v59 = vld [vmem:[#allocation3 + $0x1a0] ss:$8 sps:$4 sm:$0xff]   ;;  %v1761_v60 = vld [vmem:[#allocation3 + $0x94] ss:$8 sps:$4 sm:$0xff]  }
  0x22   :  { %892 = vmatprep.subr.bf16.mxu1 %v1709_v21  ;;  %873 = vmatprep.mubr.bf16.mxu0 %v1465_v47  ;;  %v1763_v61 = vld [vmem:[#allocation3 + $0x194] ss:$8 sps:$4 sm:$0xff]   ;;  %v1765_v62 = vld [vmem:[#allocation3 + $0x90] ss:$8 sps:$4 sm:$0xff]   ;;  %v1767_v0 = vld [vmem:[#allocation3 + $0x84] ss:$8 sps:$4 sm:$0xff]  }
  0x23   :  { %914 = vmatprep.mubr.bf16.mxu1 %v1467_v51  ;;  %v1766_v63 = vld [vmem:[#allocation3 + $0x190] ss:$8 sps:$4 sm:$0xff]   ;;  %v1769_v1 = vld [vmem:[#allocation3 + $0x184] ss:$8 sps:$4 sm:$0xff]   ;;  %v1771_v2 = vld [vmem:[#allocation3 + $0x80] ss:$8 sps:$4 sm:$0xff]  }
  0x24   :  { %852 = vmatpush1.bf16.msra.mxu0 %v1711_v22  ;;  %v1772_v3 = vld [vmem:[#allocation3 + $0x180] ss:$8 sps:$4 sm:$0xff]   ;;  %v1779_v4 = vld [vmem:[#allocation3 + $0x274] ss:$8 sps:$4 sm:$0xff]   ;;  %v1777_v8 = vld [vmem:[#allocation3 + $0x270] ss:$8 sps:$4 sm:$0xff]  }
  0x25   :  { %893 = vmatpush1.bf16.msra.mxu1 %v1712_v23  ;;  %853 = vmatprep.subr.bf16.mxu0 %v1713_v24  ;;  %v1782_v5 = vld [vmem:[#allocation3 + $0x374] ss:$8 sps:$4 sm:$0xff]   ;;  %v1780_v9 = vld [vmem:[#allocation3 + $0x370] ss:$8 sps:$4 sm:$0xff]   ;;  %v1785_v10 = vld [vmem:[#allocation3 + $0x264] ss:$8 sps:$4 sm:$0xff]  }
  0x26   :  { %894 = vmatprep.subr.bf16.mxu1 %v1715_v25  ;;  %v1788_v11 = vld [vmem:[#allocation3 + $0x364] ss:$8 sps:$4 sm:$0xff]   ;;  %v1783_v12 = vld [vmem:[#allocation3 + $0x260] ss:$8 sps:$4 sm:$0xff]   ;;  %v1791_v14 = vld [vmem:[#allocation3 + $0x254] ss:$8 sps:$4 sm:$0xff]  }
  0x27   :  { %v1786_v13 = vld [vmem:[#allocation3 + $0x360] ss:$8 sps:$4 sm:$0xff]   ;;  %v1794_v15 = vld [vmem:[#allocation3 + $0x354] ss:$8 sps:$4 sm:$0xff]   ;;  %v1789_v16 = vld [vmem:[#allocation3 + $0x250] ss:$8 sps:$4 sm:$0xff]  }
  0x28   :  { %854 = vmatpush1.bf16.msra.mxu0 %v1717_v26  ;;  %v1792_v17 = vld [vmem:[#allocation3 + $0x350] ss:$8 sps:$4 sm:$0xff]   ;;  %v1797_v18 = vld [vmem:[#allocation3 + $0x244] ss:$8 sps:$4 sm:$0xff]   ;;  %v1795_v20 = vld [vmem:[#allocation3 + $0x240] ss:$8 sps:$4 sm:$0xff]  }
  0x29   :  { %895 = vmatpush1.bf16.msra.mxu1 %v1718_v27  ;;  %855 = vmatprep.subr.bf16.mxu0 %v1719_v28  ;;  %v1800_v19 = vld [vmem:[#allocation3 + $0x344] ss:$8 sps:$4 sm:$0xff]   ;;  %v1798_v21 = vld [vmem:[#allocation3 + $0x340] ss:$8 sps:$4 sm:$0xff]   ;;  %v1803_v22 = vld [vmem:[#allocation3 + $0x234] ss:$8 sps:$4 sm:$0xff]  }
  0x2a   :  { %896 = vmatprep.subr.bf16.mxu1 %v1721_v29  ;;  %v1806_v23 = vld [vmem:[#allocation3 + $0x334] ss:$8 sps:$4 sm:$0xff]   ;;  %v1801_v24 = vld [vmem:[#allocation3 + $0x230] ss:$8 sps:$4 sm:$0xff]   ;;  %v1809_v26 = vld [vmem:[#allocation3 + $0x224] ss:$8 sps:$4 sm:$0xff]  }
  0x2b   :  { %v1804_v25 = vld [vmem:[#allocation3 + $0x330] ss:$8 sps:$4 sm:$0xff]   ;;  %v1812_v27 = vld [vmem:[#allocation3 + $0x324] ss:$8 sps:$4 sm:$0xff]   ;;  %v1807_v28 = vld [vmem:[#allocation3 + $0x220] ss:$8 sps:$4 sm:$0xff]  }
  0x2c   :  { %856 = vmatpush1.bf16.msra.mxu0 %v1723_v30  ;;  %v1810_v29 = vld [vmem:[#allocation3 + $0x320] ss:$8 sps:$4 sm:$0xff]   ;;  %v1815_v30 = vld [vmem:[#allocation3 + $0x214] ss:$8 sps:$4 sm:$0xff]   ;;  %v1833_v46 = vld [vmem:[#allocation3 + $0x2e4] ss:$8 sps:$4 sm:$0xff]  }
  0x2d   :  { %897 = vmatpush1.bf16.msra.mxu1 %v1724_v31  ;;  %857 = vmatprep.subr.bf16.mxu0 %v1725_v32  ;;  %v1818_v31 = vld [vmem:[#allocation3 + $0x314] ss:$8 sps:$4 sm:$0xff]   ;;  %v1813_v32 = vld [vmem:[#allocation3 + $0x210] ss:$8 sps:$4 sm:$0xff]   ;;  %v1836_v47 = vld [vmem:[#allocation3 + $0x3e4] ss:$8 sps:$4 sm:$0xff]  }
  0x2e   :  { %898 = vmatprep.subr.bf16.mxu1 %v1727_v33  ;;  %v1816_v33 = vld [vmem:[#allocation3 + $0x310] ss:$8 sps:$4 sm:$0xff]   ;;  %v1831_v48 = vld [vmem:[#allocation3 + $0x2e0] ss:$8 sps:$4 sm:$0xff]   ;;  %v1842_v51 = vld [vmem:[#allocation3 + $0x3d4] ss:$8 sps:$4 sm:$0xff]  }
  0x30   :  { %858 = vmatpush2.bf16.msra.mxu0 %v1729_v34  ;;  %v1995_v34 = vld [vmem:[%s2107_s0 + $0x10] sm:$0xff] }
  0x31   :  { %899 = vmatpush2.bf16.msra.mxu1 %v1730_v35  ;;  %859 = vmatprep.subr.bf16.mxu0 %v1731_v36  ;;  %v2000_v35 = vld [vmem:[%s2107_s0 + $0x18] sm:$0xff]  ;;  %v1821_v36 = vld [vmem:[#allocation3 + $0x204] ss:$8 sps:$4 sm:$0xff]  }
  0x32   :  { %900 = vmatprep.subr.bf16.mxu1 %v1733_v37  ;;  %v1824_v37 = vld [vmem:[#allocation3 + $0x304] ss:$8 sps:$4 sm:$0xff]  }
  0x34   :  { %860 = vmatpush2.bf16.msra.mxu0 %v1735_v38  ;;  %v1469_v38 = vcombine.high %v1995_v34, %v1995_v34 }
  0x35   :  { %901 = vmatpush2.bf16.msra.mxu1 %v1736_v39  ;;  %861 = vmatprep.subr.bf16.mxu0 %v1737_v40  ;;  %v1471_v39 = vcombine.high %v2000_v35, %v2000_v35  ;;  %v1819_v40 = vld [vmem:[#allocation3 + $0x200] ss:$8 sps:$4 sm:$0xff]  }
  0x36   :  { %902 = vmatprep.subr.bf16.mxu1 %v1739_v41  ;;  %v1822_v41 = vld [vmem:[#allocation3 + $0x300] ss:$8 sps:$4 sm:$0xff]  }
  0x38   :  { %862 = vmatpush2.bf16.msra.mxu0 %v1741_v42  ;;  %v1827_v42 = vld [vmem:[#allocation3 + $0x2f4] ss:$8 sps:$4 sm:$0xff]  }
  0x39   :  { %903 = vmatpush2.bf16.msra.mxu1 %v1742_v43  ;;  %863 = vmatprep.subr.bf16.mxu0 %v1743_v44  ;;  %v1830_v43 = vld [vmem:[#allocation3 + $0x3f4] ss:$8 sps:$4 sm:$0xff]   ;;  %v1825_v44 = vld [vmem:[#allocation3 + $0x2f0] ss:$8 sps:$4 sm:$0xff]  }
  0x3a   :  { %904 = vmatprep.subr.bf16.mxu1 %v1745_v45  ;;  %v1828_v45 = vld [vmem:[#allocation3 + $0x3f0] ss:$8 sps:$4 sm:$0xff]  }
  0x3c   :  { %864 = vmatpush2.bf16.msra.mxu0 %v1747_v49  ;;  %v1834_v49 = vld [vmem:[#allocation3 + $0x3e0] ss:$8 sps:$4 sm:$0xff]  }
  0x3d   :  { %905 = vmatpush2.bf16.msra.mxu1 %v1748_v50  ;;  %865 = vmatprep.subr.bf16.mxu0 %v1749_v52  ;;  %v1839_v50 = vld [vmem:[#allocation3 + $0x2d4] ss:$8 sps:$4 sm:$0xff]   ;;  %v1837_v52 = vld [vmem:[#allocation3 + $0x2d0] ss:$8 sps:$4 sm:$0xff]  }
  0x3e   :  { %906 = vmatprep.subr.bf16.mxu1 %v1751_v53  ;;  %v1840_v53 = vld [vmem:[#allocation3 + $0x3d0] ss:$8 sps:$4 sm:$0xff]  }
  0x40   :  { %866 = vmatpush2.bf16.msra.mxu0 %v1753_v54  ;;  %v1845_v54 = vld [vmem:[#allocation3 + $0x2c4] ss:$8 sps:$4 sm:$0xff]  }
  0x41   :  { %907 = vmatpush2.bf16.msra.mxu1 %v1754_v55  ;;  %867 = vmatprep.subr.bf16.mxu0 %v1755_v56  ;;  %v1848_v55 = vld [vmem:[#allocation3 + $0x3c4] ss:$8 sps:$4 sm:$0xff]   ;;  %v1843_v56 = vld [vmem:[#allocation3 + $0x2c0] ss:$8 sps:$4 sm:$0xff]  }
  0x42   :  { %908 = vmatprep.subr.bf16.mxu1 %v1757_v57  ;;  %v1846_v57 = vld [vmem:[#allocation3 + $0x3c0] ss:$8 sps:$4 sm:$0xff]  }
  0x44   :  { %868 = vmatpush2.bf16.msra.mxu0 %v1759_v58  ;;  %v1851_v58 = vld [vmem:[#allocation3 + $0x2b4] ss:$8 sps:$4 sm:$0xff]  }
  0x45   :  { %909 = vmatpush2.bf16.msra.mxu1 %v1760_v59  ;;  %869 = vmatprep.subr.bf16.mxu0 %v1761_v60  ;;  %v1854_v59 = vld [vmem:[#allocation3 + $0x3b4] ss:$8 sps:$4 sm:$0xff]   ;;  %v1849_v60 = vld [vmem:[#allocation3 + $0x2b0] ss:$8 sps:$4 sm:$0xff]  }
  0x46   :  { %910 = vmatprep.subr.bf16.mxu1 %v1763_v61  ;;  %v1852_v61 = vld [vmem:[#allocation3 + $0x3b0] ss:$8 sps:$4 sm:$0xff]  }
  0x48   :  { %870 = vmatpush2.bf16.msra.mxu0 %v1765_v62  ;;  %v1857_v62 = vld [vmem:[#allocation3 + $0x2a4] ss:$8 sps:$4 sm:$0xff]  }
  0x49   :  { %911 = vmatpush2.bf16.msra.mxu1 %v1766_v63  ;;  %871 = vmatprep.subr.bf16.mxu0 %v1767_v0  ;;  %v1860_v63 = vld [vmem:[#allocation3 + $0x3a4] ss:$8 sps:$4 sm:$0xff]   ;;  %v1855_v0 = vld [vmem:[#allocation3 + $0x2a0] ss:$8 sps:$4 sm:$0xff]  }
  0x4a   :  { %912 = vmatprep.subr.bf16.mxu1 %v1769_v1  ;;  %v1858_v1 = vld [vmem:[#allocation3 + $0x3a0] ss:$8 sps:$4 sm:$0xff]  }
  0x4c   :  { %872 = vmatpush2.bf16.msra.mxu0 %v1771_v2  ;;  %v1863_v2 = vld [vmem:[#allocation3 + $0x294] ss:$8 sps:$4 sm:$0xff]  }
  0x4d   :  { %913 = vmatpush2.bf16.msra.mxu1 %v1772_v3  ;;  %923 = vmatprep.subr.bf16.mxu0 %v1779_v4  ;;  %v1866_v3 = vld [vmem:[#allocation3 + $0x394] ss:$8 sps:$4 sm:$0xff]   ;;  %v1861_v4 = vld [vmem:[#allocation3 + $0x290] ss:$8 sps:$4 sm:$0xff]  }
  0x4e   :  { %964 = vmatprep.subr.bf16.mxu1 %v1782_v5  ;;  %v1864_v5 = vld [vmem:[#allocation3 + $0x390] ss:$8 sps:$4 sm:$0xff]  }
  0x4f   :  { %874 = vmatmul.mubr.bf16.vlgmr.msra.gmra.mxu0 %v1464_v6  ;;  %v1869_v6 = vld [vmem:[#allocation3 + $0x284] ss:$8 sps:$4 sm:$0xff]  }
  0x50   :  { %915 = vmatmul.mubr.bf16.vlgmr.msra.gmra.mxu1 %v1466_v7  ;;  %924 = vmatpush1.bf16.msra.mxu0 %v1777_v8  ;;  %v1872_v7 = vld [vmem:[#allocation3 + $0x384] ss:$8 sps:$4 sm:$0xff]   ;;  %v1867_v8 = vld [vmem:[#allocation3 + $0x280] ss:$8 sps:$4 sm:$0xff]  }
  0x51   :  { %965 = vmatpush1.bf16.msra.mxu1 %v1780_v9  ;;  %925 = vmatprep.subr.bf16.mxu0 %v1785_v10  ;;  %v1870_v9 = vld [vmem:[#allocation3 + $0x380] ss:$8 sps:$4 sm:$0xff]   ;;  %v1468_v10 = vcombine.low %v1995_v34, %v1995_v34 }
  0x52   :  { %966 = vmatprep.subr.bf16.mxu1 %v1788_v11  ;;  %955 = vmatprep.mubr.bf16.mxu0 %v1469_v38  ;;  %v1470_v11 = vcombine.low %v2000_v35, %v2000_v35 }
  0x53   :  { %996 = vmatprep.mubr.bf16.mxu1 %v1471_v39 }
  0x54   :  { %926 = vmatpush1.bf16.msra.mxu0 %v1783_v12  ;;  %v1877_v12 = vld [vmem:[%s2110_s3 + $0x78] sm:$0xff]  }
  0x55   :  { %967 = vmatpush1.bf16.msra.mxu1 %v1786_v13  ;;  %927 = vmatprep.subr.bf16.mxu0 %v1791_v14  ;;  %v1878_v13 = vld [vmem:[%s2110_s3 + $0x38] sm:$0xff]   ;;  %v1879_v14 = vld [vmem:[%s2110_s3 + $0x70] sm:$0xff]  }
  0x56   :  { %968 = vmatprep.subr.bf16.mxu1 %v1794_v15  ;;  %v1880_v15 = vld [vmem:[%s2110_s3 + $0x30] sm:$0xff]  }
  0x58   :  { %928 = vmatpush1.bf16.msra.mxu0 %v1789_v16  ;;  %v1881_v16 = vld [vmem:[%s2110_s3 + $0x68] sm:$0xff]  }
  0x59   :  { %969 = vmatpush1.bf16.msra.mxu1 %v1792_v17  ;;  %929 = vmatprep.subr.bf16.mxu0 %v1797_v18  ;;  %v1882_v17 = vld [vmem:[%s2110_s3 + $0x28] sm:$0xff]   ;;  %v1883_v18 = vld [vmem:[%s2110_s3 + $0x60] sm:$0xff]  }
  0x5a   :  { %970 = vmatprep.subr.bf16.mxu1 %v1800_v19  ;;  %v1884_v19 = vld [vmem:[%s2110_s3 + $0x20] sm:$0xff]  }
  0x5c   :  { %930 = vmatpush1.bf16.msra.mxu0 %v1795_v20  ;;  %v1885_v20 = vld [vmem:[%s2110_s3 + $0x58] sm:$0xff]  }
  0x5d   :  { %971 = vmatpush1.bf16.msra.mxu1 %v1798_v21  ;;  %931 = vmatprep.subr.bf16.mxu0 %v1803_v22  ;;  %v1886_v21 = vld [vmem:[%s2110_s3 + $0x18] sm:$0xff]   ;;  %v1887_v22 = vld [vmem:[%s2110_s3 + $0x50] sm:$0xff]  }
  0x5e   :  { %972 = vmatprep.subr.bf16.mxu1 %v1806_v23  ;;  %v1888_v23 = vld [vmem:[%s2110_s3 + $0x10] sm:$0xff]  }
  0x60   :  { %932 = vmatpush1.bf16.msra.mxu0 %v1801_v24  ;;  %v1889_v24 = vld [vmem:[%s2110_s3 + $0x48] sm:$0xff]  }
  0x61   :  { %973 = vmatpush1.bf16.msra.mxu1 %v1804_v25  ;;  %933 = vmatprep.subr.bf16.mxu0 %v1809_v26  ;;  %v1890_v25 = vld [vmem:[%s2110_s3 + $0x8] sm:$0xff]   ;;  %v1891_v26 = vld [vmem:[%s2110_s3 + $0x40] sm:$0xff]  }
  0x62   :  { %974 = vmatprep.subr.bf16.mxu1 %v1812_v27  ;;  %v1892_v27 = vld [vmem:[%s2110_s3] sm:$0xff]  }
  0x64   :  { %934 = vmatpush1.bf16.msra.mxu0 %v1807_v28 }
  0x65   :  { %975 = vmatpush1.bf16.msra.mxu1 %v1810_v29  ;;  %935 = vmatprep.subr.bf16.mxu0 %v1815_v30 }
  0x66   :  { %976 = vmatprep.subr.bf16.mxu1 %v1818_v31 }
  0x68   :  { %936 = vmatpush1.bf16.msra.mxu0 %v1813_v32 }
  0x69   :  { %977 = vmatpush1.bf16.msra.mxu1 %v1816_v33  ;;  %937 = vmatprep.subr.bf16.mxu0 %v1821_v36 }
  0x6a   :  { %978 = vmatprep.subr.bf16.mxu1 %v1824_v37  ;;  %v1016_v37 = vlaneseq }
  0x6c   :  { %938 = vmatpush1.bf16.msra.mxu0 %v1819_v40  ;;  %v1017_v38 = vshrl.u32 %v1016_v37, 7  ;;  %v1014_v40 = vld [vmem:[%s2109_s2] sm:$0x3]  ;;  %s1957_s2 = smov [#allocation6]  }
  0x6d   :  { %979 = vmatpush1.bf16.msra.mxu1 %v1822_v41  ;;  %939 = vmatprep.subr.bf16.mxu0 %v1827_v42  ;;  %s1455_s3 = sshll.u32 %s1957_s2, 4  ;;  %s1456_s3 = int_to_ptr.vmem [resolvable:$true] %s1455_s3 }
  0x6e   :  { %980 = vmatprep.subr.bf16.mxu1 %v1830_v43  ;;  %v2058_v39 = vsub.s32 0, %v1017_v38  ;;  %v2063_v41 = vsub.s32 1, %v1017_v38  ;;  %vm1030_vm0 = vcmp.lt.s32.totalorder %v1017_v38, 2  ;;  %s1929_s8 = scalar_lea.vmem %s1456_s3, 128  ;;  %p1934_p6 = scmp.lt.s32.totalorder %s1456_s3, %s1456_s3 }
  0x6f   :  { %p1930_p5 = scmp.ne.s32.totalorder %s1456_s3, %s1929_s8  ;;  %p1935_p7 = scmp.lt.s32.totalorder %s1929_s8, %s1929_s8 }
  0x70   :  { %940 = vmatpush2.bf16.msra.mxu0 %v1825_v44  ;;  %v1956_v44 = vmov 1966171168  }
  0x71   :  { %981 = vmatpush2.bf16.msra.mxu1 %v1828_v45  ;;  %941 = vmatprep.subr.bf16.mxu0 %v1833_v46  ;;  %v1047_v45 = vunpack.c.l.s4 %v1956_v44  ;;  %p1936_p8 = por %p1935_p7, %p1934_p6 }
  0x72   :  { %982 = vmatprep.subr.bf16.mxu1 %v1836_v47 }
  0x73   :  { %p1937_p9 = pnand %p1936_p8, %p1930_p5 }
  0x74   :  { %942 = vmatpush2.bf16.msra.mxu0 %v1831_v48  ;;  %v1019_v48 = vrot.slane %v1014_v40, %v2058_v39 }
  0x75   :  { %983 = vmatpush2.bf16.msra.mxu1 %v1834_v49  ;;  %943 = vmatprep.subr.bf16.mxu0 %v1839_v50 }
  0x76   :  { %984 = vmatprep.subr.bf16.mxu1 %v1842_v51 }
  0x78   :  { %944 = vmatpush2.bf16.msra.mxu0 %v1837_v52 }
  0x79   :  { %985 = vmatpush2.bf16.msra.mxu1 %v1840_v53  ;;  %945 = vmatprep.subr.bf16.mxu0 %v1845_v54  ;;  %v1023_v53 = vrot.slane %v1014_v40, %v2063_v41  ;;  %v1048_v54 = vunpack.c.0.s8 %v1047_v45 }
  0x7a   :  { %986 = vmatprep.subr.bf16.mxu1 %v1848_v55 }
  0x7c   :  { %946 = vmatpush2.bf16.msra.mxu0 %v1843_v56 }
  0x7d   :  { %987 = vmatpush2.bf16.msra.mxu1 %v1846_v57  ;;  %947 = vmatprep.subr.bf16.mxu0 %v1851_v58 }
  0x7e   :  { %988 = vmatprep.subr.bf16.mxu1 %v1854_v59 }
  0x80   :  { %948 = vmatpush2.bf16.msra.mxu0 %v1849_v60 }
  0x81   :  { %989 = vmatpush2.bf16.msra.mxu1 %v1852_v61  ;;  %949 = vmatprep.subr.bf16.mxu0 %v1857_v62  ;;  %v1051_v62 = vsub.s32 %v1048_v54, %v1017_v38 }
  0x82   :  { %990 = vmatprep.subr.bf16.mxu1 %v1860_v63 }
  0x84   :  { %950 = vmatpush2.bf16.msra.mxu0 %v1855_v0 }
  0x85   :  { %991 = vmatpush2.bf16.msra.mxu1 %v1858_v1  ;;  %951 = vmatprep.subr.bf16.mxu0 %v1863_v2 }
  0x86   :  { %992 = vmatprep.subr.bf16.mxu1 %v1866_v3 }
  0x88   :  { %952 = vmatpush2.bf16.msra.mxu0 %v1861_v4 }
  0x89   :  { %993 = vmatpush2.bf16.msra.mxu1 %v1864_v5  ;;  %953 = vmatprep.subr.bf16.mxu0 %v1869_v6 }
  0x8a   :  { %994 = vmatprep.subr.bf16.mxu1 %v1872_v7 }
  0x8c   :  { %954 = vmatpush2.bf16.msra.mxu0 %v1867_v8 }
  0x8d   :  { %995 = vmatpush2.bf16.msra.mxu1 %v1870_v9  ;;  %1616 = vmatprep.subr.bf16.mxu0 %v1877_v12 }
  0x8e   :  { %1656 = vmatprep.subr.bf16.mxu1 %v1877_v12 }
  0x8f   :  { %956 = vmatmul.mubr.bf16.vlgmr.msra.gmra.mxu0 %v1468_v10 }
  0x90   :  { %997 = vmatmul.mubr.bf16.vlgmr.msra.gmra.mxu1 %v1470_v11  ;;  %1617 = vmatpush3.bf16.msra.mxu0 %v1878_v13 }
  0x91   :  { %1664 = vmatpush3.bf16.msra.mxu1 %v1878_v13  ;;  %1618 = vmatprep.subr.bf16.mxu0 %v1879_v14 }
  0x92   :  { %1657 = vmatprep.subr.bf16.mxu1 %v1879_v14 }
  0x94   :  { %1619 = vmatpush3.bf16.msra.mxu0 %v1880_v15 }
  0x95   :  { %1665 = vmatpush3.bf16.msra.mxu1 %v1880_v15  ;;  %1620 = vmatprep.subr.bf16.mxu0 %v1881_v16 }
  0x96   :  { %1658 = vmatprep.subr.bf16.mxu1 %v1881_v16 }
  0x98   :  { %1621 = vmatpush3.bf16.msra.mxu0 %v1882_v17 }
  0x99   :  { %1666 = vmatpush3.bf16.msra.mxu1 %v1882_v17  ;;  %1622 = vmatprep.subr.bf16.mxu0 %v1883_v18 }
  0x9a   :  { %1659 = vmatprep.subr.bf16.mxu1 %v1883_v18 }
  0x9c   :  { %1623 = vmatpush3.bf16.msra.mxu0 %v1884_v19 }
  0x9d   :  { %1667 = vmatpush3.bf16.msra.mxu1 %v1884_v19  ;;  %1624 = vmatprep.subr.bf16.mxu0 %v1885_v20 }
  0x9e   :  { %1660 = vmatprep.subr.bf16.mxu1 %v1885_v20 }
  0xa0   :  { %1625 = vmatpush3.bf16.msra.mxu0 %v1886_v21 }
  0xa1   :  { %1668 = vmatpush3.bf16.msra.mxu1 %v1886_v21  ;;  %1626 = vmatprep.subr.bf16.mxu0 %v1887_v22 }
  0xa2   :  { %1661 = vmatprep.subr.bf16.mxu1 %v1887_v22 }
  0xa4   :  { %1627 = vmatpush3.bf16.msra.mxu0 %v1888_v23 }
  0xa5   :  { %1669 = vmatpush3.bf16.msra.mxu1 %v1888_v23  ;;  %1628 = vmatprep.subr.bf16.mxu0 %v1889_v24 }
  0xa6   :  { %1662 = vmatprep.subr.bf16.mxu1 %v1889_v24 }
  0xa8   :  { %1629 = vmatpush3.bf16.msra.mxu0 %v1890_v25 }
  0xa9   :  { %1670 = vmatpush3.bf16.msra.mxu1 %v1890_v25  ;;  %1630 = vmatprep.subr.bf16.mxu0 %v1891_v26 }
  0xaa   :  { %1663 = vmatprep.subr.bf16.mxu1 %v1891_v26 }
  0xac   :  { %1631 = vmatpush3.bf16.msra.mxu0 %v1892_v27 }
  0xad   :  { %1671 = vmatpush3.bf16.msra.mxu1 %v1892_v27 }
 0x10f   :  { %v875_v28 = vpop.f32.mrf.mxu0 }
 0x110   :  { %v916_v29 = vpop.f32.mrf.mxu1 }
 0x111   :  { %v917_v30 = vadd.f32 %v916_v29, %v875_v28  ;;  %v877_v31 = vpop.f32.mrf.mxu0 }
 0x112   :  { %v918_v32 = vpop.f32.mrf.mxu1 }
 0x113   :  { %v879_v33 = vpop.f32.mrf.mxu0  ;;  %v919_v46 = vadd.f32 %v918_v32, %v877_v31 }
 0x114   :  { %v920_v34 = vpop.f32.mrf.mxu1 }
 0x115   :  { %v880_v35 = vpop.f32.mrf.mxu0 }
 0x116   :  { %v921_v36 = vpop.f32.mrf.mxu1 }
 0x14f   :  { %v957_v42 = vpop.f32.mrf.mxu0 }
 0x150   :  { %v998_v43 = vpop.f32.mrf.mxu1  ;;  %v958_v47 = vadd.f32 %v957_v42, %v917_v30 }
 0x151   :  { %v959_v49 = vpop.f32.mrf.mxu0 }
 0x152   :  { %v1000_v50 = vpop.f32.mrf.mxu1  ;;  %v999_v51 = vadd.f32 %v998_v43, %v958_v47  ;;  %v960_v52 = vadd.f32 %v959_v49, %v919_v46 }
 0x153   :  { %v961_v55 = vpop.f32.mrf.mxu0 }
 0x154   :  { %v1002_v56 = vpop.f32.mrf.mxu1  ;;  %v1026_v57 = vadd.f32 %v1019_v48, %v999_v51  ;;  %v1001_v58 = vadd.f32 %v1000_v50, %v960_v52 }
 0x155   :  { %v962_v59 = vpop.f32.mrf.mxu0 }
 0x156   :  { %v1003_v60 = vpop.f32.mrf.mxu1  ;;  %v1027_v61 = vadd.f32 %v1023_v53, %v1001_v58  ;;  %v2067_v63 = vsel %vm1030_vm0, %v1026_v57, 1e+09 }
 0x158   :  { %v1032_v0 = vsel %vm1030_vm0, %v1027_v61, 1e+09 }
 0x159   :  { %v1044_v1 = vcombine.low %v2067_v63, %v1032_v0  ;;  %v1045_v2 = vcombine.high %v2067_v63, %v1032_v0 }
 0x15b   :  { %v1052_v3 = vrot.slane %v1044_v1, %v1051_v62  ;;  %v1059_v4 = vrot.slane %v1045_v2, %v1051_v62 }
 0x15d   :  { %v1060_v5 = vcombine.high %v1052_v3, %v1052_v3  ;;  %v1068_v6 = vrot.slane %v1052_v3, %v1051_v62  ;;  %v1061_v7 = vcombine.high %v1059_v4, %v1059_v4  ;;  %v1075_v8 = vrot.slane %v1059_v4, %v1051_v62 }
 0x15f   :  { %v1082_v9 = vrot.slane %v1060_v5, %v1051_v62  ;;  %v1101_v10 = vrot.slane %v1068_v6, %v2063_v41  ;;  %v1089_v11 = vrot.slane %v1061_v7, %v1051_v62  ;;  %v1133_v12 = vrot.slane %v1075_v8, %v2063_v41 }
 0x160   :  { %v1097_v13 = vrot.slane %v1068_v6, %v2058_v39  ;;  %v1129_v14 = vrot.slane %v1075_v8, %v2058_v39  ;;  %v1090_v15 = vcombine.high %v1068_v6, %v1068_v6  ;;  %v1091_v16 = vcombine.high %v1075_v8, %v1075_v8 }
 0x161   :  { %v1109_v17 = vrot.slane %v1082_v9, %v2063_v41  ;;  %v1175_v18 = vsub.f32 %v1032_v0, %v1101_v10  ;;  %v1141_v19 = vrot.slane %v1089_v11, %v2063_v41  ;;  %v1183_v20 = vsub.f32 %v1032_v0, %v1133_v12 }
 0x162   :  { %v1105_v21 = vrot.slane %v1082_v9, %v2058_v39  ;;  %v1174_v22 = vsub.f32 %v2067_v63, %v1097_v13  ;;  %v1137_v23 = vrot.slane %v1089_v11, %v2058_v39  ;;  %v1182_v24 = vsub.f32 %v2067_v63, %v1129_v14 }
 0x163   :  { %v1177_v25 = vsub.f32 %v1032_v0, %v1109_v17  ;;  %v1191_v26 = vand.u32 2147483647, %v1175_v18  ;;  %v1185_v27 = vsub.f32 %v1032_v0, %v1141_v19  ;;  %v1199_v28 = vand.u32 2147483647, %v1183_v20 }
 0x164   :  { %v1176_v29 = vsub.f32 %v2067_v63, %v1105_v21  ;;  %v1190_v30 = vand.u32 2147483647, %v1174_v22  ;;  %v1184_v31 = vsub.f32 %v2067_v63, %v1137_v23  ;;  %v1198_v32 = vand.u32 2147483647, %v1182_v24 }
 0x165   :  { %v1193_v33 = vand.u32 2147483647, %v1177_v25  ;;  %v1201_v34 = vand.u32 2147483647, %v1185_v27  ;;  %v1092_v35 = vcombine.high %v1082_v9, %v1082_v9  ;;  %v1117_v36 = vrot.slane %v1090_v15, %v2063_v41 }
 0x166   :  { %v1192_v37 = vand.u32 2147483647, %v1176_v29  ;;  %v1200_v38 = vand.u32 2147483647, %v1184_v31  ;;  %v1093_v40 = vcombine.high %v1089_v11, %v1089_v11  ;;  %v1149_v42 = vrot.slane %v1091_v16, %v2063_v41 }
 0x167   :  { %v1207_v43 = vpack.c.bf16 %v1193_v33, %v1191_v26  ;;  %v1211_v44 = vpack.c.bf16 %v1201_v34, %v1199_v28  ;;  %v1125_v45 = vrot.slane %v1092_v35, %v2063_v41  ;;  %v1179_v46 = vsub.f32 %v1032_v0, %v1117_v36 }
 0x168   :  { %v1206_v47 = vpack.c.bf16 %v1192_v37, %v1190_v30  ;;  %v1210_v48 = vpack.c.bf16 %v1200_v38, %v1198_v32  ;;  %v1157_v49 = vrot.slane %v1093_v40, %v2063_v41  ;;  %v1187_v50 = vsub.f32 %v1032_v0, %v1149_v42 }
 0x169   :  { %1374 = vmatprep.mubr.bf16.mxu0 %v1207_v43  ;;  %1390 = vmatprep.mubr.bf16.mxu1 %v1211_v44  ;;  %v1181_v51 = vsub.f32 %v1032_v0, %v1125_v45  ;;  %v1113_v52 = vrot.slane %v1090_v15, %v2058_v39  ;;  %v1121_v53 = vrot.slane %v1092_v35, %v2058_v39  ;;  %v1195_v57 = vand.u32 2147483647, %v1179_v46 }
 0x16a   :  { %1375 = vmatmul.mubr.bf16.vlgmr.msra.gmra.mxu0 %v1206_v47  ;;  %1391 = vmatmul.mubr.bf16.vlgmr.msra.gmra.mxu1 %v1210_v48  ;;  %v1189_v54 = vsub.f32 %v1032_v0, %v1157_v49  ;;  %v1145_v55 = vrot.slane %v1091_v16, %v2058_v39  ;;  %v1153_v56 = vrot.slane %v1093_v40, %v2058_v39  ;;  %v1203_v60 = vand.u32 2147483647, %v1187_v50 }
 0x16b   :  { %v1197_v58 = vand.u32 2147483647, %v1181_v51  ;;  %v1178_v59 = vsub.f32 %v2067_v63, %v1113_v52  ;;  %v1180_v41 = vsub.f32 %v2067_v63, %v1121_v53 }
 0x16c   :  { %v1205_v61 = vand.u32 2147483647, %v1189_v54  ;;  %v1186_v62 = vsub.f32 %v2067_v63, %v1145_v55  ;;  %v1188_v1 = vsub.f32 %v2067_v63, %v1153_v56 }
 0x16d   :  { %v1209_v2 = vpack.c.bf16 %v1197_v58, %v1195_v57  ;;  %v1196_v3 = vand.u32 2147483647, %v1180_v41  ;;  %v1194_v0 = vand.u32 2147483647, %v1178_v59 }
 0x16e   :  { %v1213_v4 = vpack.c.bf16 %v1205_v61, %v1203_v60  ;;  %v1202_v5 = vand.u32 2147483647, %v1186_v62  ;;  %v1204_v6 = vand.u32 2147483647, %v1188_v1 }
 0x16f   :  { %1382 = vmatprep.mubr.bf16.mxu0 %v1209_v2  ;;  %v1208_v39 = vpack.c.bf16 %v1196_v3, %v1194_v0 }
 0x170   :  { %1398 = vmatprep.mubr.bf16.mxu1 %v1213_v4  ;;  %v1212_v7 = vpack.c.bf16 %v1204_v6, %v1202_v5 }
 0x172   :  { %1383 = vmatmul.mubr.bf16.gmra.mxu0 %v1208_v39  ;;  %1399 = vmatmul.mubr.bf16.gmra.mxu1 %v1212_v7 }
 0x22a   :  { %v1632_v8 = vpop.f32.mrf.mxu0  ;;  %v1644_v9 = vpop.f32.mrf.mxu1 }
 0x22c   :  { %v1633_v10 = vpop.f32.mrf.mxu0  ;;  %v1645_v11 = vpop.f32.mrf.mxu1 }
 0x22d   :  { %v1634_v12 = vadd.f32 %v1633_v10, %v1632_v8  ;;  %v1646_v18 = vadd.f32 %v1645_v11, %v1644_v9 }
 0x22e   :  { %v1635_v13 = vpop.f32.mrf.mxu0  ;;  %v1647_v14 = vpop.f32.mrf.mxu1 }
 0x22f   :  { %v1407_v63 = vsub.f32 0.0, %v1634_v12  ;;  %v1411_v28 = vsub.f32 0.0, %v1646_v18 }
 0x230   :  { %v1636_v15 = vpop.f32.mrf.mxu0  ;;  %v1648_v16 = vpop.f32.mrf.mxu1 }
 0x231   :  { %v1637_v17 = vadd.f32 %v1636_v15, %v1635_v13  ;;  %v1415_v22 = vmul.f32 1.442695, %v1407_v63  ;;  %v1649_v26 = vadd.f32 %v1648_v16, %v1647_v14  ;;  %v1423_v40 = vmul.f32 1.442695, %v1411_v28 }
 0x232   :  { %v1638_v19 = vpop.f32.mrf.mxu0  ;;  %v1650_v20 = vpop.f32.mrf.mxu1 }
 0x233   :  { %v1408_v21 = vsub.f32 0.0, %v1637_v17  ;;  %v1412_v35 = vsub.f32 0.0, %v1649_v26 }
 0x234   :  { %v1639_v23 = vpop.f32.mrf.mxu0  ;;  %v1651_v24 = vpop.f32.mrf.mxu1 }
 0x235   :  { %v1417_v25 = vmul.f32 1.442695, %v1408_v21  ;;  %v1640_v27 = vadd.f32 %v1639_v23, %v1638_v19  ;;  %v1652_v32 = vadd.f32 %v1651_v24, %v1650_v20  ;;  %v1425_v44 = vmul.f32 1.442695, %v1412_v35 }
 0x236   :  { %v1641_v29 = vpop.f32.mrf.mxu0  ;;  %v1653_v30 = vpop.f32.mrf.mxu1 }
 0x237   :  { %1893 = vpow2.f32 %v1417_v25  ;;  %v1409_v31 = vsub.f32 0.0, %v1640_v27  ;;  %v1413_v42 = vsub.f32 0.0, %v1652_v32 }
 0x238   :  { %1895 = vpow2.f32 %v1415_v22  ;;  %v1642_v33 = vpop.f32.mrf.mxu0  ;;  %v1654_v34 = vpop.f32.mrf.mxu1 }
 0x239   :  { %v1419_v36 = vmul.f32 1.442695, %v1409_v31  ;;  %v1643_v37 = vadd.f32 %v1642_v33, %v1641_v29  ;;  %v1655_v38 = vadd.f32 %v1654_v34, %v1653_v30  ;;  %v1427_v47 = vmul.f32 1.442695, %v1413_v42 }
 0x23b   :  { %1897 = vpow2.f32 %v1419_v36  ;;  %v1410_v43 = vsub.f32 0.0, %v1643_v37  ;;  %v1414_v46 = vsub.f32 0.0, %v1655_v38 }
 0x23c   :  { %1899 = vpow2.f32 %v1423_v40 }
 0x23d   :  { %v1421_v45 = vmul.f32 1.442695, %v1410_v43  ;;  %v1429_v48 = vmul.f32 1.442695, %v1414_v46 }
 0x23f   :  { %1901 = vpow2.f32 %v1421_v45 }
 0x240   :  { %1903 = vpow2.f32 %v1425_v44 }
 0x241   :  { %1905 = vpow2.f32 %v1427_v47 }
 0x242   :  { %1907 = vpow2.f32 %v1429_v48 }
 0x244   :  { %v1894_v49 = vpop.eup %1893 }
 0x245   :  { %v1896_v50 = vpop.eup %1895  ;;  %v1433_v51 = vsel %vm1431_vm1, %v1894_v49, 0.0 }
 0x246   :  { %v1432_v53 = vsel %vm1431_vm1, %v1896_v50, 0.0 }
 0x247   :  { %v1434_v55 = vadd.f32 %v1433_v51, %v1432_v53 }
 0x248   :  { %v1898_v52 = vpop.eup %1897 }
 0x249   :  { %v1435_v54 = vsel %vm1431_vm1, %v1898_v52, 0.0  ;;  %v1900_v56 = vpop.eup %1899 }
 0x24a   :  { %v1436_v58 = vadd.f32 %v1435_v54, %v1434_v55  ;;  %v1439_v61 = vsel %vm1431_vm1, %v1900_v56, 0.0 }
 0x24c   :  { %v1902_v57 = vpop.eup %1901 }
 0x24d   :  { %v1437_v59 = vsel %vm1431_vm1, %v1902_v57, 0.0  ;;  %v1904_v41 = vpop.eup %1903 }
 0x24e   :  { %v1438_v60 = vadd.f32 %v1437_v59, %v1436_v58  ;;  %v1906_v62 = vpop.eup %1905  ;;  %v1441_v2 = vsel %vm1431_vm1, %v1904_v41, 0.0 }
 0x24f   :  { %v1908_v3 = vpop.eup %1907  ;;  %v1443_v0 = vsel %vm1431_vm1, %v1906_v62, 0.0 }
 0x250   :  { %v1440_v1 = vadd.f32 %v1439_v61, %v1438_v60  ;;  %v1445_v6 = vsel %vm1431_vm1, %v1908_v3, 0.0 }
 0x252   :  { %v1442_v4 = vadd.f32 %v1441_v2, %v1440_v1 }
 0x254   :  { %v1444_v5 = vadd.f32 %v1443_v0, %v1442_v4 }
 0x256   :  { %v1446_v39 = vadd.f32 %v1445_v6, %v1444_v5 }
 0x258   :  { %1448 = vst.msk [vmem:[#allocation6] sm:$0xff] %vm1431_vm1, %v1446_v39 }
 0x259   :  { %1940 = shalt.err (!%p1937_p9)
}
 0x25a   :  { %1458 = dma.vmem_to_hbm [thread:$0]  %s1456_s3, 128, %s2111_s4, [#allocation5]  }
 0x25b   :  { %1951 = dma.done.wait [#allocation5], 128  }
 0x25c   :  { %1952 = vsyncadd [#allocation5], 4294967168 }
 0x25d   :  { %1462 = vsyncpa [#allocation4], 1 }
 0x25e   :  { %1463 = vsyncpa [#allocation5], 1 }

</bundles_post_ra>
